<compile_context>
chip_gen: v5e
topology: v5e:2x2
jax: 0.10.0
libtpu: 0.0.40
codegen_flags: <defaults>
</compile_context>

<pallas_src>
import functools
import math

import jax
import jax.numpy as jnp
from jax.experimental import pallas as pl
from jax.experimental.pallas import tpu as pltpu

_LN_EPS = 1e-5


def _vmem_limit_bytes() -> int:
    """Explicit scoped-VMEM budget (defaults are only 16/32 MiB)."""
    limit = 56 * 1024 * 1024            # fits under v7x's 64 MiB physical VMEM
    try:
        cap = pltpu.get_tpu_info().vmem_capacity_bytes
        limit = min(limit, cap - cap // 8)   # leave DMA headroom on any chip
    except Exception:
        pass
    return int(limit)


_VMEM_LIMIT = _vmem_limit_bytes()


# ---------------------------------------------------------------------------
# Parameter construction (matches the PyTorch __init__ math exactly,
# including the 2*(i+1)/embed_size divisor for the cos columns).
# ---------------------------------------------------------------------------
def make_positional_encoding(embed_size: int, max_len: int = 100) -> jnp.ndarray:
    assert embed_size % 2 == 0, "spec writes pe[:, i+1]; embed_size must be even"
    pos = jnp.arange(max_len, dtype=jnp.float32)[:, None]
    even = jnp.arange(0, embed_size, 2, dtype=jnp.float32)
    div_even = jnp.power(10000.0, 2.0 * even / embed_size)
    div_odd = jnp.power(10000.0, 2.0 * (even + 1.0) / embed_size)
    pe_even = jnp.sin(pos / div_even)
    pe_odd = jnp.cos(pos / div_odd)
    return (jnp.stack([pe_even, pe_odd], axis=-1)
            .reshape(max_len, embed_size).astype(jnp.float32))


# ---------------------------------------------------------------------------
# Kernels
# ---------------------------------------------------------------------------
def _attn_block_kernel(x_ref, wqkv_ref, wo_ref, bo_ref, mask_ref, g_ref, beta_ref,
                       o_ref, *, heads, scale, eps):
    """Fused attention block for one batch element:
       QKV proj (full-width MXU) -> per-head scores/softmax/PV -> in-VMEM head
       concat -> output proj -> bias -> residual -> LayerNorm."""
    x = x_ref[...]                                                      # (S, E)
    _, E = x.shape
    D = E // heads
    qkv = jnp.dot(x, wqkv_ref[...], preferred_element_type=jnp.float32)  # (S, 3E)
    mask = mask_ref[...]                                                # (1, S) int32
    ctx_heads = []
    for h in range(heads):                                  # static unroll
        q_h = qkv[:, h * D:(h + 1) * D]
        k_h = qkv[:, E + h * D:E + (h + 1) * D]
        v_h = qkv[:, 2 * E + h * D:2 * E + (h + 1) * D]
        energy = jax.lax.dot_general(q_h, k_h, (((1,), (1,)), ((), ())),
                                     preferred_element_type=jnp.float32)  # (S, S)
        # masked_fill(mask == 0, -1e20) on the key axis, then scale (matches torch).
        energy = jnp.where(mask == 0, -1e20, energy) * scale
        p = jnp.exp(energy - jnp.max(energy, axis=-1, keepdims=True))
        attn = p * pl.reciprocal(jnp.sum(p, axis=-1, keepdims=True), approx=True)
        ctx_heads.append(jnp.dot(attn, v_h, preferred_element_type=jnp.float32))
    ctx = jnp.concatenate(ctx_heads, axis=-1)     # (S, E): head concat stays in VMEM
    z = (jnp.dot(ctx, wo_ref[...], preferred_element_type=jnp.float32)
         + bo_ref[...] + x)                       # output proj + bias + residual
    mu = jnp.mean(z, axis=-1, keepdims=True)
    var = jnp.mean(jnp.square(z - mu), axis=-1, keepdims=True)
    o_ref[...] = (z - mu) * jax.lax.rsqrt(var + eps) * g_ref[...] + beta_ref[...]


def _ffn_add_ln_kernel(x_ref, w1_ref, b1_ref, w2_ref, b2_ref, g_ref, beta_ref,
                       o_ref, acc_ref, *, eps):
    """FFN (ReLU MLP) + residual + LayerNorm over (ROW_TILE, E) rows, with the
       hidden dimension tiled along the last ("arbitrary") grid axis."""
    j = pl.program_id(1)
    x = x_ref[...]                                                      # (R, E)

    @pl.when(j == 0)
    def _():
        acc_ref[...] = x + b2_ref[...]            # residual + second-layer bias

    h = jnp.maximum(
        jnp.dot(x, w1_ref[...], preferred_element_type=jnp.float32) + b1_ref[...],
        0.0)                                                            # (R, Hd_t)
    acc_ref[...] += jnp.dot(h, w2_ref[...], preferred_element_type=jnp.float32)

    @pl.when(j == pl.num_programs(1) - 1)
    def _():
        z = acc_ref[...]
        mu = jnp.mean(z, axis=-1, keepdims=True)
        var = jnp.mean(jnp.square(z - mu), axis=-1, keepdims=True)
        o_ref[...] = (z - mu) * jax.lax.rsqrt(var + eps) * g_ref[...] + beta_ref[...]


def _mean_fc_kernel(x_ref, w_ref, b_ref, o_ref, acc_ref, *, inv_s):
    """Mean pool over the sequence (accumulated across the S grid axis) then FC."""
    si = pl.program_id(1)

    @pl.when(si == 0)
    def _():
        acc_ref[...] = jnp.zeros_like(acc_ref)

    acc_ref[...] += jnp.sum(x_ref[...], axis=1)                         # (B_t, E)

    @pl.when(si == pl.num_programs(1) - 1)
    def _():
        o_ref[...] = (jnp.dot(acc_ref[...] * inv_s, w_ref[...],
                              preferred_element_type=jnp.float32) + b_ref[...])


# ---------------------------------------------------------------------------
# Tiling helpers
# ---------------------------------------------------------------------------
def _pick_row_tile(rows: int, feat: int, bytes_per_elem: int = 4,
                   target_bytes: int = 2 * 1024 * 1024) -> int:
    """Largest row tile (multiple of 8, <= rows) giving ~MiB-scale f32 blocks."""
    if rows <= 8:
        return rows
    tile = min(rows, max(8, target_bytes // (feat * bytes_per_elem)))
    return max(8, min(rows, (tile // 8) * 8))


def _pick_divisor_tile(n: int, target: int, quantum: int) -> int:
    """Largest divisor of n that is a multiple of `quantum` and <= target, else n."""
    if n <= target:
        return n
    t = (target // quantum) * quantum
    while t >= quantum:
        if n % t == 0:
            return t
        t -= quantum
    return n


# ---------------------------------------------------------------------------
# Wrappers (pallas_call plumbing)
# ---------------------------------------------------------------------------
def attention_block(x, wqkv, wo, bo, mask3, gamma, beta, *, heads, eps=_LN_EPS):
    B, S, E = x.shape
    kern = functools.partial(_attn_block_kernel, heads=heads,
                             scale=1.0 / math.sqrt(E), eps=eps)
    return pl.pallas_call(
        kern,
        out_shape=jax.ShapeDtypeStruct((B, S, E), jnp.float32),
        grid=(B,),
        in_specs=[
            pl.BlockSpec((None, S, E), lambda b: (b, 0, 0)),
            pl.BlockSpec((E, 3 * E), lambda b: (0, 0)),   # fused QKV weight (N=3E)
            pl.BlockSpec((E, E), lambda b: (0, 0)),
            pl.BlockSpec((1, E), lambda b: (0, 0)),
            pl.BlockSpec((None, 1, S), lambda b: (b, 0, 0)),
            pl.BlockSpec((1, E), lambda b: (0, 0)),
            pl.BlockSpec((1, E), lambda b: (0, 0)),
        ],
        out_specs=pl.BlockSpec((None, S, E), lambda b: (b, 0, 0)),
        input_output_aliases={0: 0},      # in-place over the residual input
        compiler_params=pltpu.CompilerParams(
            dimension_semantics=("parallel",),
            vmem_limit_bytes=_VMEM_LIMIT),
    )(x, wqkv, wo, bo, mask3, gamma, beta)


def ffn_residual_layernorm(x_flat, w1, b1, w2, b2, gamma, beta, *, eps=_LN_EPS):
    R, E = x_flat.shape
    Hd = w1.shape[1]
    hd_tile = _pick_divisor_tile(Hd, target=1024, quantum=128)
    row_tile = _pick_row_tile(R, max(E, hd_tile))
    kern = functools.partial(_ffn_add_ln_kernel, eps=eps)
    return pl.pallas_call(
        kern,
        out_shape=jax.ShapeDtypeStruct((R, E), jnp.float32),
        grid=(pl.cdiv(R, row_tile), Hd // hd_tile),
        in_specs=[
            pl.BlockSpec((row_tile, E), lambda i, j: (i, 0)),
            pl.BlockSpec((E, hd_tile), lambda i, j: (0, j)),
            pl.BlockSpec((1, hd_tile), lambda i, j: (0, j)),
            pl.BlockSpec((hd_tile, E), lambda i, j: (j, 0)),
            pl.BlockSpec((1, E), lambda i, j: (0, 0)),
            pl.BlockSpec((1, E), lambda i, j: (0, 0)),
            pl.BlockSpec((1, E), lambda i, j: (0, 0)),
        ],
        out_specs=pl.BlockSpec((row_tile, E), lambda i, j: (i, 0)),
        scratch_shapes=[pltpu.VMEM((row_tile, E), jnp.float32)],
        input_output_aliases={0: 0},      # in-place over the residual input
        compiler_params=pltpu.CompilerParams(
            dimension_semantics=("parallel", "arbitrary"),
            vmem_limit_bytes=_VMEM_LIMIT),
    )(x_flat, w1, b1, w2, b2, gamma, beta)


def mean_pool_fc(x, wf, bf):
    B, S, E = x.shape
    C = wf.shape[1]
    b_tile = B if B <= 8 else 8
    s_tile = _pick_divisor_tile(S, target=512, quantum=8)
    kern = functools.partial(_mean_fc_kernel, inv_s=1.0 / S)
    return pl.pallas_call(
        kern,
        out_shape=jax.ShapeDtypeStruct((B, C), jnp.float32),
        grid=(pl.cdiv(B, b_tile), S // s_tile),
        in_specs=[
            pl.BlockSpec((b_tile, s_tile, E), lambda bi, si: (bi, si, 0)),
            pl.BlockSpec((E, C), lambda bi, si: (0, 0)),
            pl.BlockSpec((1, C), lambda bi, si: (0, 0)),
        ],
        out_specs=pl.BlockSpec((b_tile, C), lambda bi, si: (bi, 0)),
        scratch_shapes=[pltpu.VMEM((b_tile, E), jnp.float32)],
        compiler_params=pltpu.CompilerParams(
            dimension_semantics=("parallel", "arbitrary"),
            vmem_limit_bytes=_VMEM_LIMIT),
    )(x, wf, bf)


# ---------------------------------------------------------------------------
# Full forward pass (Pallas) and a pure-JAX reference.
# ---------------------------------------------------------------------------
def transformer_forward(params, ids, mask, *, heads):
    B, S = ids.shape
    E = params["embedding"].shape[1]
    # TODO(synk): embedding gather + PE add intentionally left to XLA's fused
    # gather (perf review option (a): bandwidth-trivial, per-token grids pay
    # ~0.35us/step); dropout layers are identity at inference.
    x = params["embedding"][ids] + params["pe"][None, :S, :]
    mask3 = (mask != 0).astype(jnp.int32).reshape(B, 1, S)   # int mask (no float ==)
    for lp in params["layers"]:
        wqkv = jnp.concatenate([lp["wq"], lp["wk"], lp["wv"]], axis=1)   # (E, 3E)
        x1 = attention_block(x, wqkv, lp["wo"], lp["bo"], mask3,
                             lp["g1"], lp["beta1"], heads=heads)
        x2 = ffn_residual_layernorm(x1.reshape(B * S, E), lp["w1"], lp["b1"],
                                    lp["w2"], lp["b2"], lp["g2"], lp["beta2"])
        x = x2.reshape(B, S, E)
    return mean_pool_fc(x, params["wf"], params["bf"])


def transformer_reference(params, ids, mask, heads, eps=_LN_EPS):
    hp = jax.lax.Precision.HIGHEST
    B, S = ids.shape
    E = params["embedding"].shape[1]
    D = E // heads

    def layer_norm(z, g, b):
        mu = z.mean(-1, keepdims=True)
        var = jnp.square(z - mu).mean(-1, keepdims=True)
        return (z - mu) * jax.lax.rsqrt(var + eps) * g + b

    x = params["embedding"][ids] + params["pe"][None, :S, :]
    for lp in params["layers"]:
        q = jnp.einsum("bse,ef->bsf", x, lp["wq"], precision=hp).reshape(B, S, heads, D)
        k = jnp.einsum("bse,ef->bsf", x, lp["wk"], precision=hp).reshape(B, S, heads, D)
        v = jnp.einsum("bse,ef->bsf", x, lp["wv"], precision=hp).reshape(B, S, heads, D)
        energy = jnp.einsum("bqhd,bkhd->bhqk", q, k, precision=hp)
        energy = jnp.where(mask[:, None, None, :] == 0, -1e20, energy)
        attn = jax.nn.softmax(energy / math.sqrt(E), axis=-1)
        ctx = jnp.einsum("bhqk,bkhd->bqhd", attn, v, precision=hp).reshape(B, S, E)
        att_out = jnp.einsum("bse,ef->bsf", ctx, lp["wo"], precision=hp) + lp["bo"]
        x1 = layer_norm(att_out + x, lp["g1"], lp["beta1"])
        h = jax.nn.relu(jnp.einsum("bse,ef->bsf", x1, lp["w1"], precision=hp) + lp["b1"])
        ff = jnp.einsum("bsf,fe->bse", h, lp["w2"], precision=hp) + lp["b2"]
        x = layer_norm(ff + x1, lp["g2"], lp["beta2"])
    pooled = x.mean(axis=1)
    return jnp.dot(pooled, params["wf"], precision=hp) + params["bf"]


def init_params(key, vocab, num_classes, max_len, embed, num_layers, ff_exp, heads):
    assert embed % 2 == 0 and embed % heads == 0
    ks = jax.random.split(key, 2 + num_layers)
    s_e = 1.0 / math.sqrt(embed)
    hidden = ff_exp * embed
    params = {
        "embedding": jax.random.normal(ks[0], (vocab, embed), jnp.float32) * 0.1,
        "pe": make_positional_encoding(embed, max_len),
        "wf": jax.random.normal(ks[1], (embed, num_classes), jnp.float32) * s_e,
        "bf": jnp.zeros((1, num_classes), jnp.float32),
        "layers": [],
    }
    for l in range(num_layers):
        lk = jax.random.split(ks[2 + l], 10)
        params["layers"].append({
            "wq": jax.random.normal(lk[0], (embed, embed), jnp.float32) * s_e,
            "wk": jax.random.normal(lk[1], (embed, embed), jnp.float32) * s_e,
            "wv": jax.random.normal(lk[2], (embed, embed), jnp.float32) * s_e,
            "wo": jax.random.normal(lk[3], (embed, embed), jnp.float32) * s_e,
            "bo": jax.random.normal(lk[4], (1, embed), jnp.float32) * 0.02,
            "g1": 1.0 + 0.05 * jax.random.normal(lk[5], (1, embed), jnp.float32),
            "beta1": 0.02 * jax.random.normal(lk[6], (1, embed), jnp.float32),
            "w1": jax.random.normal(lk[7], (embed, hidden), jnp.float32) * s_e,
            "b1": jnp.zeros((1, hidden), jnp.float32),
            "w2": jax.random.normal(lk[8], (hidden, embed), jnp.float32) * (1.0 / math.sqrt(hidden)),
            "b2": jnp.zeros((1, embed), jnp.float32),
            "g2": jnp.ones((1, embed), jnp.float32),
            "beta2": 0.02 * jax.random.normal(lk[9], (1, embed), jnp.float32),
        })
    return params


if __name__ == "__main__":
    VOCAB, NUM_CLASSES, MAX_LEN = 50, 4, 100
    EMBED, HEADS, NUM_LAYERS, FF_EXP = 32, 4, 2, 4
    BATCH, SEQ = 2, 8

    key = jax.random.PRNGKey(0)
    k_param, k_ids = jax.random.split(key)
    params = init_params(k_param, VOCAB, NUM_CLASSES, MAX_LEN, EMBED,
                         NUM_LAYERS, FF_EXP, HEADS)

    ids = jax.random.randint(k_ids, (BATCH, SEQ), 0, VOCAB, dtype=jnp.int32)
    mask = jnp.ones((BATCH, SEQ), dtype=jnp.float32)
    mask = mask.at[1, SEQ - 2:].set(0.0)   # mask the last two keys of batch 1

    fwd = jax.jit(functools.partial(transformer_forward, heads=HEADS))
    logits = jax.block_until_ready(fwd(params, ids, mask))

    ref = transformer_reference(params, ids, mask, HEADS)
    assert logits.shape == (BATCH, NUM_CLASSES)
    max_err = float(jnp.max(jnp.abs(logits - ref)))
    assert bool(jnp.allclose(logits, ref, atol=2e-2, rtol=2e-2)), (
        f"mismatch vs reference, max abs err = {max_err}")

    print("KERNEL_OK")
</pallas_src>

<mosaic_0001>
module attributes {stable_mosaic.version = 11 : i64} {
  func.func @_attn_block_kernel(%arg0: i32, %arg1: memref<1x8x32xf32, #tpu.memory_space<vmem>>, %arg2: memref<32x96xf32, #tpu.memory_space<vmem>>, %arg3: memref<32x32xf32, #tpu.memory_space<vmem>>, %arg4: memref<1x32xf32, #tpu.memory_space<vmem>>, %arg5: memref<1x1x8xi32, #tpu.memory_space<vmem>>, %arg6: memref<1x32xf32, #tpu.memory_space<vmem>>, %arg7: memref<1x32xf32, #tpu.memory_space<vmem>>, %arg8: memref<1x8x32xf32, #tpu.memory_space<vmem>>) attributes {dimension_semantics = [#tpu.dimension_semantics<parallel>], iteration_bounds = array<i64: 2>, scalar_prefetch = 0 : i64, scratch_operands = 0 : i64, tpu.core_type = #tpu.core_type<tc>, window_params = [{transform_indices = @transform_0, window_bounds = array<i64: 1, 8, 32>}, {pipeline_mode = #tpu.pipeline_mode<synchronous>, transform_indices = @transform_1, window_bounds = array<i64: 32, 96>}, {pipeline_mode = #tpu.pipeline_mode<synchronous>, transform_indices = @transform_2, window_bounds = array<i64: 32, 32>}, {pipeline_mode = #tpu.pipeline_mode<synchronous>, transform_indices = @transform_3, window_bounds = array<i64: 1, 32>}, {transform_indices = @transform_4, window_bounds = array<i64: 1, 1, 8>}, {pipeline_mode = #tpu.pipeline_mode<synchronous>, transform_indices = @transform_5, window_bounds = array<i64: 1, 32>}, {pipeline_mode = #tpu.pipeline_mode<synchronous>, transform_indices = @transform_6, window_bounds = array<i64: 1, 32>}, {transform_indices = @transform_7, window_bounds = array<i64: 1, 8, 32>}]} {
    %c0 = arith.constant 0 : index
    %c0_0 = arith.constant 0 : index
    %c0_1 = arith.constant 0 : index
    %0 = vector.load %arg1[%c0, %c0_0, %c0_1] : memref<1x8x32xf32, #tpu.memory_space<vmem>>, vector<1x8x32xf32>
    %1 = vector.shape_cast %0 : vector<1x8x32xf32> to vector<8x32xf32>
    %c0_2 = arith.constant 0 : index
    %c0_3 = arith.constant 0 : index
    %2 = vector.load %arg2[%c0_2, %c0_3] : memref<32x96xf32, #tpu.memory_space<vmem>>, vector<32x96xf32>
    %cst = arith.constant dense<0.000000e+00> : vector<8x96xf32>
    %3 = tpu.matmul %1, %2, %cst {dimension_numbers = #tpu.dot_dimension_numbers<[1], [0], [0], [1], [0, 0, 1, 1], [], []>} : vector<8x32xf32>, vector<32x96xf32>, vector<8x96xf32> -> vector<8x96xf32>
    %c0_4 = arith.constant 0 : index
    %c0_5 = arith.constant 0 : index
    %c0_6 = arith.constant 0 : index
    %4 = vector.load %arg5[%c0_4, %c0_5, %c0_6] : memref<1x1x8xi32, #tpu.memory_space<vmem>>, vector<1x1x8xi32>
    %5 = vector.shape_cast %4 : vector<1x1x8xi32> to vector<1x8xi32>
    %6 = vector.extract_strided_slice %3 {offsets = [0, 0], sizes = [8, 8], strides = [1, 1]} : vector<8x96xf32> to vector<8x8xf32>
    %7 = vector.extract_strided_slice %3 {offsets = [0, 32], sizes = [8, 8], strides = [1, 1]} : vector<8x96xf32> to vector<8x8xf32>
    %8 = vector.extract_strided_slice %3 {offsets = [0, 64], sizes = [8, 8], strides = [1, 1]} : vector<8x96xf32> to vector<8x8xf32>
    %cst_7 = arith.constant dense<0.000000e+00> : vector<8x8xf32>
    %9 = tpu.matmul %6, %7, %cst_7 {dimension_numbers = #tpu.dot_dimension_numbers<[1], [1], [0], [0], [0, 0, 1, 0], [], []>} : vector<8x8xf32>, vector<8x8xf32>, vector<8x8xf32> -> vector<8x8xf32>
    %c0_i32 = arith.constant 0 : i32
    %10 = vector.broadcast %c0_i32 : i32 to vector<1x8xi32>
    %11 = arith.cmpi eq, %5, %10 : vector<1x8xi32>
    %cst_8 = arith.constant -1.000000e+20 : f32
    %12 = vector.shape_cast %11 : vector<1x8xi1> to vector<1x8xi1>
    %13 = vector.broadcast %12 : vector<1x8xi1> to vector<8x8xi1>
    %14 = vector.broadcast %cst_8 : f32 to vector<8x8xf32>
    %15 = arith.select %13, %14, %9 : vector<8x8xi1>, vector<8x8xf32>
    %cst_9 = arith.constant 0.176776692 : f32
    %16 = vector.broadcast %cst_9 : f32 to vector<8x8xf32>
    %17 = arith.mulf %15, %16 : vector<8x8xf32>
    %cst_10 = arith.constant dense<0xFF800000> : vector<8xf32>
    %18 = vector.multi_reduction <maximumf>, %17, %cst_10 [1] : vector<8x8xf32> to vector<8xf32>
    %19 = vector.shape_cast %18 : vector<8xf32> to vector<8x1xf32>
    %20 = vector.broadcast %19 : vector<8x1xf32> to vector<8x8xf32>
    %21 = arith.subf %17, %20 : vector<8x8xf32>
    %22 = math.exp %21 : vector<8x8xf32>
    %cst_11 = arith.constant dense<0.000000e+00> : vector<8xf32>
    %23 = vector.multi_reduction <add>, %22, %cst_11 [1] : vector<8x8xf32> to vector<8xf32>
    %24 = vector.shape_cast %23 : vector<8xf32> to vector<8x1xf32>
    %25 = tpu.reciprocal %24 {approx = true} : vector<8x1xf32> -> vector<8x1xf32>
    %26 = vector.broadcast %25 : vector<8x1xf32> to vector<8x8xf32>
    %27 = arith.mulf %22, %26 : vector<8x8xf32>
    %cst_12 = arith.constant dense<0.000000e+00> : vector<8x8xf32>
    %28 = tpu.matmul %27, %8, %cst_12 {dimension_numbers = #tpu.dot_dimension_numbers<[1], [0], [0], [1], [0, 0, 1, 1], [], []>} : vector<8x8xf32>, vector<8x8xf32>, vector<8x8xf32> -> vector<8x8xf32>
    %29 = vector.extract_strided_slice %3 {offsets = [0, 8], sizes = [8, 8], strides = [1, 1]} : vector<8x96xf32> to vector<8x8xf32>
    %30 = vector.extract_strided_slice %3 {offsets = [0, 40], sizes = [8, 8], strides = [1, 1]} : vector<8x96xf32> to vector<8x8xf32>
    %31 = vector.extract_strided_slice %3 {offsets = [0, 72], sizes = [8, 8], strides = [1, 1]} : vector<8x96xf32> to vector<8x8xf32>
    %cst_13 = arith.constant dense<0.000000e+00> : vector<8x8xf32>
    %32 = tpu.matmul %29, %30, %cst_13 {dimension_numbers = #tpu.dot_dimension_numbers<[1], [1], [0], [0], [0, 0, 1, 0], [], []>} : vector<8x8xf32>, vector<8x8xf32>, vector<8x8xf32> -> vector<8x8xf32>
    %c0_i32_14 = arith.constant 0 : i32
    %33 = vector.broadcast %c0_i32_14 : i32 to vector<1x8xi32>
    %34 = arith.cmpi eq, %5, %33 : vector<1x8xi32>
    %cst_15 = arith.constant -1.000000e+20 : f32
    %35 = vector.shape_cast %34 : vector<1x8xi1> to vector<1x8xi1>
    %36 = vector.broadcast %35 : vector<1x8xi1> to vector<8x8xi1>
    %37 = vector.broadcast %cst_15 : f32 to vector<8x8xf32>
    %38 = arith.select %36, %37, %32 : vector<8x8xi1>, vector<8x8xf32>
    %cst_16 = arith.constant 0.176776692 : f32
    %39 = vector.broadcast %cst_16 : f32 to vector<8x8xf32>
    %40 = arith.mulf %38, %39 : vector<8x8xf32>
    %cst_17 = arith.constant dense<0xFF800000> : vector<8xf32>
    %41 = vector.multi_reduction <maximumf>, %40, %cst_17 [1] : vector<8x8xf32> to vector<8xf32>
    %42 = vector.shape_cast %41 : vector<8xf32> to vector<8x1xf32>
    %43 = vector.broadcast %42 : vector<8x1xf32> to vector<8x8xf32>
    %44 = arith.subf %40, %43 : vector<8x8xf32>
    %45 = math.exp %44 : vector<8x8xf32>
    %cst_18 = arith.constant dense<0.000000e+00> : vector<8xf32>
    %46 = vector.multi_reduction <add>, %45, %cst_18 [1] : vector<8x8xf32> to vector<8xf32>
    %47 = vector.shape_cast %46 : vector<8xf32> to vector<8x1xf32>
    %48 = tpu.reciprocal %47 {approx = true} : vector<8x1xf32> -> vector<8x1xf32>
    %49 = vector.broadcast %48 : vector<8x1xf32> to vector<8x8xf32>
    %50 = arith.mulf %45, %49 : vector<8x8xf32>
    %cst_19 = arith.constant dense<0.000000e+00> : vector<8x8xf32>
    %51 = tpu.matmul %50, %31, %cst_19 {dimension_numbers = #tpu.dot_dimension_numbers<[1], [0], [0], [1], [0, 0, 1, 1], [], []>} : vector<8x8xf32>, vector<8x8xf32>, vector<8x8xf32> -> vector<8x8xf32>
    %52 = vector.extract_strided_slice %3 {offsets = [0, 16], sizes = [8, 8], strides = [1, 1]} : vector<8x96xf32> to vector<8x8xf32>
    %53 = vector.extract_strided_slice %3 {offsets = [0, 48], sizes = [8, 8], strides = [1, 1]} : vector<8x96xf32> to vector<8x8xf32>
    %54 = vector.extract_strided_slice %3 {offsets = [0, 80], sizes = [8, 8], strides = [1, 1]} : vector<8x96xf32> to vector<8x8xf32>
    %cst_20 = arith.constant dense<0.000000e+00> : vector<8x8xf32>
    %55 = tpu.matmul %52, %53, %cst_20 {dimension_numbers = #tpu.dot_dimension_numbers<[1], [1], [0], [0], [0, 0, 1, 0], [], []>} : vector<8x8xf32>, vector<8x8xf32>, vector<8x8xf32> -> vector<8x8xf32>
    %c0_i32_21 = arith.constant 0 : i32
    %56 = vector.broadcast %c0_i32_21 : i32 to vector<1x8xi32>
    %57 = arith.cmpi eq, %5, %56 : vector<1x8xi32>
    %cst_22 = arith.constant -1.000000e+20 : f32
    %58 = vector.shape_cast %57 : vector<1x8xi1> to vector<1x8xi1>
    %59 = vector.broadcast %58 : vector<1x8xi1> to vector<8x8xi1>
    %60 = vector.broadcast %cst_22 : f32 to vector<8x8xf32>
    %61 = arith.select %59, %60, %55 : vector<8x8xi1>, vector<8x8xf32>
    %cst_23 = arith.constant 0.176776692 : f32
    %62 = vector.broadcast %cst_23 : f32 to vector<8x8xf32>
    %63 = arith.mulf %61, %62 : vector<8x8xf32>
    %cst_24 = arith.constant dense<0xFF800000> : vector<8xf32>
    %64 = vector.multi_reduction <maximumf>, %63, %cst_24 [1] : vector<8x8xf32> to vector<8xf32>
    %65 = vector.shape_cast %64 : vector<8xf32> to vector<8x1xf32>
    %66 = vector.broadcast %65 : vector<8x1xf32> to vector<8x8xf32>
    %67 = arith.subf %63, %66 : vector<8x8xf32>
    %68 = math.exp %67 : vector<8x8xf32>
    %cst_25 = arith.constant dense<0.000000e+00> : vector<8xf32>
    %69 = vector.multi_reduction <add>, %68, %cst_25 [1] : vector<8x8xf32> to vector<8xf32>
    %70 = vector.shape_cast %69 : vector<8xf32> to vector<8x1xf32>
    %71 = tpu.reciprocal %70 {approx = true} : vector<8x1xf32> -> vector<8x1xf32>
    %72 = vector.broadcast %71 : vector<8x1xf32> to vector<8x8xf32>
    %73 = arith.mulf %68, %72 : vector<8x8xf32>
    %cst_26 = arith.constant dense<0.000000e+00> : vector<8x8xf32>
    %74 = tpu.matmul %73, %54, %cst_26 {dimension_numbers = #tpu.dot_dimension_numbers<[1], [0], [0], [1], [0, 0, 1, 1], [], []>} : vector<8x8xf32>, vector<8x8xf32>, vector<8x8xf32> -> vector<8x8xf32>
    %75 = vector.extract_strided_slice %3 {offsets = [0, 24], sizes = [8, 8], strides = [1, 1]} : vector<8x96xf32> to vector<8x8xf32>
    %76 = vector.extract_strided_slice %3 {offsets = [0, 56], sizes = [8, 8], strides = [1, 1]} : vector<8x96xf32> to vector<8x8xf32>
    %77 = vector.extract_strided_slice %3 {offsets = [0, 88], sizes = [8, 8], strides = [1, 1]} : vector<8x96xf32> to vector<8x8xf32>
    %cst_27 = arith.constant dense<0.000000e+00> : vector<8x8xf32>
    %78 = tpu.matmul %75, %76, %cst_27 {dimension_numbers = #tpu.dot_dimension_numbers<[1], [1], [0], [0], [0, 0, 1, 0], [], []>} : vector<8x8xf32>, vector<8x8xf32>, vector<8x8xf32> -> vector<8x8xf32>
    %c0_i32_28 = arith.constant 0 : i32
    %79 = vector.broadcast %c0_i32_28 : i32 to vector<1x8xi32>
    %80 = arith.cmpi eq, %5, %79 : vector<1x8xi32>
    %cst_29 = arith.constant -1.000000e+20 : f32
    %81 = vector.shape_cast %80 : vector<1x8xi1> to vector<1x8xi1>
    %82 = vector.broadcast %81 : vector<1x8xi1> to vector<8x8xi1>
    %83 = vector.broadcast %cst_29 : f32 to vector<8x8xf32>
    %84 = arith.select %82, %83, %78 : vector<8x8xi1>, vector<8x8xf32>
    %cst_30 = arith.constant 0.176776692 : f32
    %85 = vector.broadcast %cst_30 : f32 to vector<8x8xf32>
    %86 = arith.mulf %84, %85 : vector<8x8xf32>
    %cst_31 = arith.constant dense<0xFF800000> : vector<8xf32>
    %87 = vector.multi_reduction <maximumf>, %86, %cst_31 [1] : vector<8x8xf32> to vector<8xf32>
    %88 = vector.shape_cast %87 : vector<8xf32> to vector<8x1xf32>
    %89 = vector.broadcast %88 : vector<8x1xf32> to vector<8x8xf32>
    %90 = arith.subf %86, %89 : vector<8x8xf32>
    %91 = math.exp %90 : vector<8x8xf32>
    %cst_32 = arith.constant dense<0.000000e+00> : vector<8xf32>
    %92 = vector.multi_reduction <add>, %91, %cst_32 [1] : vector<8x8xf32> to vector<8xf32>
    %93 = vector.shape_cast %92 : vector<8xf32> to vector<8x1xf32>
    %94 = tpu.reciprocal %93 {approx = true} : vector<8x1xf32> -> vector<8x1xf32>
    %95 = vector.broadcast %94 : vector<8x1xf32> to vector<8x8xf32>
    %96 = arith.mulf %91, %95 : vector<8x8xf32>
    %cst_33 = arith.constant dense<0.000000e+00> : vector<8x8xf32>
    %97 = tpu.matmul %96, %77, %cst_33 {dimension_numbers = #tpu.dot_dimension_numbers<[1], [0], [0], [1], [0, 0, 1, 1], [], []>} : vector<8x8xf32>, vector<8x8xf32>, vector<8x8xf32> -> vector<8x8xf32>
    %98 = tpu.concatenate %28, %51, %74, %97 in 1 : vector<8x8xf32>, vector<8x8xf32>, vector<8x8xf32>, vector<8x8xf32> -> vector<8x32xf32>
    %c0_34 = arith.constant 0 : index
    %c0_35 = arith.constant 0 : index
    %99 = vector.load %arg3[%c0_34, %c0_35] : memref<32x32xf32, #tpu.memory_space<vmem>>, vector<32x32xf32>
    %cst_36 = arith.constant dense<0.000000e+00> : vector<8x32xf32>
    %100 = tpu.matmul %98, %99, %cst_36 {dimension_numbers = #tpu.dot_dimension_numbers<[1], [0], [0], [1], [0, 0, 1, 1], [], []>} : vector<8x32xf32>, vector<32x32xf32>, vector<8x32xf32> -> vector<8x32xf32>
    %c0_37 = arith.constant 0 : index
    %c0_38 = arith.constant 0 : index
    %101 = vector.load %arg4[%c0_37, %c0_38] : memref<1x32xf32, #tpu.memory_space<vmem>>, vector<1x32xf32>
    %102 = vector.broadcast %101 : vector<1x32xf32> to vector<8x32xf32>
    %103 = arith.addf %100, %102 : vector<8x32xf32>
    %104 = arith.addf %103, %1 : vector<8x32xf32>
    %cst_39 = arith.constant dense<0.000000e+00> : vector<8xf32>
    %105 = vector.multi_reduction <add>, %104, %cst_39 [1] : vector<8x32xf32> to vector<8xf32>
    %106 = vector.shape_cast %105 : vector<8xf32> to vector<8x1xf32>
    %cst_40 = arith.constant 3.200000e+01 : f32
    %107 = vector.broadcast %cst_40 : f32 to vector<8x1xf32>
    %108 = arith.divf %106, %107 : vector<8x1xf32>
    %109 = vector.broadcast %108 : vector<8x1xf32> to vector<8x32xf32>
    %110 = arith.subf %104, %109 : vector<8x32xf32>
    %111 = arith.mulf %110, %110 : vector<8x32xf32>
    %cst_41 = arith.constant dense<0.000000e+00> : vector<8xf32>
    %112 = vector.multi_reduction <add>, %111, %cst_41 [1] : vector<8x32xf32> to vector<8xf32>
    %113 = vector.shape_cast %112 : vector<8xf32> to vector<8x1xf32>
    %cst_42 = arith.constant 3.200000e+01 : f32
    %114 = vector.broadcast %cst_42 : f32 to vector<8x1xf32>
    %115 = arith.divf %113, %114 : vector<8x1xf32>
    %116 = vector.broadcast %108 : vector<8x1xf32> to vector<8x32xf32>
    %117 = arith.subf %104, %116 : vector<8x32xf32>
    %cst_43 = arith.constant 9.99999974E-6 : f32
    %118 = vector.broadcast %cst_43 : f32 to vector<8x1xf32>
    %119 = arith.addf %115, %118 : vector<8x1xf32>
    %120 = math.rsqrt %119 : vector<8x1xf32>
    %121 = vector.broadcast %120 : vector<8x1xf32> to vector<8x32xf32>
    %122 = arith.mulf %117, %121 : vector<8x32xf32>
    %c0_44 = arith.constant 0 : index
    %c0_45 = arith.constant 0 : index
    %123 = vector.load %arg6[%c0_44, %c0_45] : memref<1x32xf32, #tpu.memory_space<vmem>>, vector<1x32xf32>
    %124 = vector.broadcast %123 : vector<1x32xf32> to vector<8x32xf32>
    %125 = arith.mulf %122, %124 : vector<8x32xf32>
    %c0_46 = arith.constant 0 : index
    %c0_47 = arith.constant 0 : index
    %126 = vector.load %arg7[%c0_46, %c0_47] : memref<1x32xf32, #tpu.memory_space<vmem>>, vector<1x32xf32>
    %127 = vector.broadcast %126 : vector<1x32xf32> to vector<8x32xf32>
    %128 = arith.addf %125, %127 : vector<8x32xf32>
    %c0_48 = arith.constant 0 : index
    %c0_49 = arith.constant 0 : index
    %c0_50 = arith.constant 0 : index
    %129 = vector.load %arg8[%c0_48, %c0_49, %c0_50] : memref<1x8x32xf32, #tpu.memory_space<vmem>>, vector<1x8x32xf32>
    %130 = vector.shape_cast %129 : vector<1x8x32xf32> to vector<8x32xf32>
    %131 = vector.shape_cast %128 : vector<8x32xf32> to vector<1x8x32xf32>
    tpu.vector_store %arg8[%c0_48, %c0_49, %c0_50], %131 {strides = array<i32>} : memref<1x8x32xf32, #tpu.memory_space<vmem>>, vector<1x8x32xf32>,
    return
  }
  func.func @transform_0(%arg0: i32) -> (i32, i32, i32) {
    %c0_i32 = arith.constant 0 : i32
    %c0_i32_0 = arith.constant 0 : i32
    %c0_i32_1 = arith.constant 0 : i32
    return %arg0, %c0_i32, %c0_i32_0 : i32, i32, i32
  }
  func.func @transform_1(%arg0: i32) -> (i32, i32) {
    %c0_i32 = arith.constant 0 : i32
    %c0_i32_0 = arith.constant 0 : i32
    %c0_i32_1 = arith.constant 0 : i32
    return %c0_i32, %c0_i32_0 : i32, i32
  }
  func.func @transform_2(%arg0: i32) -> (i32, i32) {
    %c0_i32 = arith.constant 0 : i32
    %c0_i32_0 = arith.constant 0 : i32
    %c0_i32_1 = arith.constant 0 : i32
    return %c0_i32, %c0_i32_0 : i32, i32
  }
  func.func @transform_3(%arg0: i32) -> (i32, i32) {
    %c0_i32 = arith.constant 0 : i32
    %c0_i32_0 = arith.constant 0 : i32
    %c0_i32_1 = arith.constant 0 : i32
    return %c0_i32, %c0_i32_0 : i32, i32
  }
  func.func @transform_4(%arg0: i32) -> (i32, i32, i32) {
    %c0_i32 = arith.constant 0 : i32
    %c0_i32_0 = arith.constant 0 : i32
    %c0_i32_1 = arith.constant 0 : i32
    return %arg0, %c0_i32, %c0_i32_0 : i32, i32, i32
  }
  func.func @transform_5(%arg0: i32) -> (i32, i32) {
    %c0_i32 = arith.constant 0 : i32
    %c0_i32_0 = arith.constant 0 : i32
    %c0_i32_1 = arith.constant 0 : i32
    return %c0_i32, %c0_i32_0 : i32, i32
  }
  func.func @transform_6(%arg0: i32) -> (i32, i32) {
    %c0_i32 = arith.constant 0 : i32
    %c0_i32_0 = arith.constant 0 : i32
    %c0_i32_1 = arith.constant 0 : i32
    return %c0_i32, %c0_i32_0 : i32, i32
  }
  func.func @transform_7(%arg0: i32) -> (i32, i32, i32) {
    %c0_i32 = arith.constant 0 : i32
    %c0_i32_0 = arith.constant 0 : i32
    %c0_i32_1 = arith.constant 0 : i32
    return %arg0, %c0_i32, %c0_i32_0 : i32, i32, i32
  }
}

module attributes {stable_mosaic.version = 11 : i64} {
  func.func @_ffn_add_ln_kernel(%arg0: i32, %arg1: i32, %arg2: memref<16x32xf32, #tpu.memory_space<vmem>>, %arg3: memref<32x128xf32, #tpu.memory_space<vmem>>, %arg4: memref<1x128xf32, #tpu.memory_space<vmem>>, %arg5: memref<128x32xf32, #tpu.memory_space<vmem>>, %arg6: memref<1x32xf32, #tpu.memory_space<vmem>>, %arg7: memref<1x32xf32, #tpu.memory_space<vmem>>, %arg8: memref<1x32xf32, #tpu.memory_space<vmem>>, %arg9: memref<16x32xf32, #tpu.memory_space<vmem>>, %arg10: memref<16x32xf32, #tpu.memory_space<vmem>>) attributes {dimension_semantics = [#tpu.dimension_semantics<parallel>, #tpu.dimension_semantics<arbitrary>], iteration_bounds = array<i64: 1, 1>, scalar_prefetch = 0 : i64, scratch_operands = 1 : i64, tpu.core_type = #tpu.core_type<tc>, window_params = [{transform_indices = @transform_0, window_bounds = array<i64: 16, 32>}, {transform_indices = @transform_1, window_bounds = array<i64: 32, 128>}, {transform_indices = @transform_2, window_bounds = array<i64: 1, 128>}, {transform_indices = @transform_3, window_bounds = array<i64: 128, 32>}, {pipeline_mode = #tpu.pipeline_mode<synchronous>, transform_indices = @transform_4, window_bounds = array<i64: 1, 32>}, {pipeline_mode = #tpu.pipeline_mode<synchronous>, transform_indices = @transform_5, window_bounds = array<i64: 1, 32>}, {pipeline_mode = #tpu.pipeline_mode<synchronous>, transform_indices = @transform_6, window_bounds = array<i64: 1, 32>}, {transform_indices = @transform_7, window_bounds = array<i64: 16, 32>}]} {
    %c0 = arith.constant 0 : index
    %c0_0 = arith.constant 0 : index
    %0 = vector.load %arg2[%c0, %c0_0] : memref<16x32xf32, #tpu.memory_space<vmem>>, vector<16x32xf32>
    %c0_i32 = arith.constant 0 : i32
    %1 = arith.cmpi eq, %arg1, %c0_i32 : i32
    %2 = arith.extui %1 : i1 to i32
    %c0_i32_1 = arith.constant 0 : i32
    %3 = arith.cmpi ne, %2, %c0_i32_1 : i32
    scf.if %3 {
      %c0_16 = arith.constant 0 : index
      %c0_17 = arith.constant 0 : index
      %19 = vector.load %arg6[%c0_16, %c0_17] : memref<1x32xf32, #tpu.memory_space<vmem>>, vector<1x32xf32>
      %20 = vector.broadcast %19 : vector<1x32xf32> to vector<16x32xf32>
      %21 = arith.addf %0, %20 : vector<16x32xf32>
      %c0_18 = arith.constant 0 : index
      %c0_19 = arith.constant 0 : index
      %22 = vector.load %arg10[%c0_18, %c0_19] : memref<16x32xf32, #tpu.memory_space<vmem>>, vector<16x32xf32>
      tpu.vector_store %arg10[%c0_18, %c0_19], %21 {strides = array<i32>} : memref<16x32xf32, #tpu.memory_space<vmem>>, vector<16x32xf32>,
    } else {
    }
    %c0_2 = arith.constant 0 : index
    %c0_3 = arith.constant 0 : index
    %4 = vector.load %arg3[%c0_2, %c0_3] : memref<32x128xf32, #tpu.memory_space<vmem>>, vector<32x128xf32>
    %cst = arith.constant dense<0.000000e+00> : vector<16x128xf32>
    %5 = tpu.matmul %0, %4, %cst {dimension_numbers = #tpu.dot_dimension_numbers<[1], [0], [0], [1], [0, 0, 1, 1], [], []>} : vector<16x32xf32>, vector<32x128xf32>, vector<16x128xf32> -> vector<16x128xf32>
    %c0_4 = arith.constant 0 : index
    %c0_5 = arith.constant 0 : index
    %6 = vector.load %arg4[%c0_4, %c0_5] : memref<1x128xf32, #tpu.memory_space<vmem>>, vector<1x128xf32>
    %7 = vector.broadcast %6 : vector<1x128xf32> to vector<16x128xf32>
    %8 = arith.addf %5, %7 : vector<16x128xf32>
    %cst_6 = arith.constant 0.000000e+00 : f32
    %9 = vector.broadcast %cst_6 : f32 to vector<16x128xf32>
    %10 = arith.maximumf %8, %9 : vector<16x128xf32>
    %c0_7 = arith.constant 0 : index
    %c0_8 = arith.constant 0 : index
    %11 = vector.load %arg10[%c0_7, %c0_8] : memref<16x32xf32, #tpu.memory_space<vmem>>, vector<16x32xf32>
    %c0_9 = arith.constant 0 : index
    %c0_10 = arith.constant 0 : index
    %12 = vector.load %arg5[%c0_9, %c0_10] : memref<128x32xf32, #tpu.memory_space<vmem>>, vector<128x32xf32>
    %cst_11 = arith.constant dense<0.000000e+00> : vector<16x32xf32>
    %13 = tpu.matmul %10, %12, %cst_11 {dimension_numbers = #tpu.dot_dimension_numbers<[1], [0], [0], [1], [0, 0, 1, 1], [], []>} : vector<16x128xf32>, vector<128x32xf32>, vector<16x32xf32> -> vector<16x32xf32>
    %14 = arith.addf %11, %13 : vector<16x32xf32>
    %c0_12 = arith.constant 0 : index
    %c0_13 = arith.constant 0 : index
    %15 = vector.load %arg10[%c0_12, %c0_13] : memref<16x32xf32, #tpu.memory_space<vmem>>, vector<16x32xf32>
    tpu.vector_store %arg10[%c0_12, %c0_13], %14 {strides = array<i32>} : memref<16x32xf32, #tpu.memory_space<vmem>>, vector<16x32xf32>,
    %c0_i32_14 = arith.constant 0 : i32
    %16 = arith.cmpi eq, %arg1, %c0_i32_14 : i32
    %17 = arith.extui %16 : i1 to i32
    %c0_i32_15 = arith.constant 0 : i32
    %18 = arith.cmpi ne, %17, %c0_i32_15 : i32
    scf.if %18 {
      %c0_16 = arith.constant 0 : index
      %c0_17 = arith.constant 0 : index
      %19 = vector.load %arg10[%c0_16, %c0_17] : memref<16x32xf32, #tpu.memory_space<vmem>>, vector<16x32xf32>
      %cst_18 = arith.constant dense<0.000000e+00> : vector<16xf32>
      %20 = vector.multi_reduction <add>, %19, %cst_18 [1] : vector<16x32xf32> to vector<16xf32>
      %21 = vector.shape_cast %20 : vector<16xf32> to vector<16x1xf32>
      %cst_19 = arith.constant 3.200000e+01 : f32
      %22 = vector.broadcast %cst_19 : f32 to vector<16x1xf32>
      %23 = arith.divf %21, %22 : vector<16x1xf32>
      %24 = vector.broadcast %23 : vector<16x1xf32> to vector<16x32xf32>
      %25 = arith.subf %19, %24 : vector<16x32xf32>
      %26 = arith.mulf %25, %25 : vector<16x32xf32>
      %cst_20 = arith.constant dense<0.000000e+00> : vector<16xf32>
      %27 = vector.multi_reduction <add>, %26, %cst_20 [1] : vector<16x32xf32> to vector<16xf32>
      %28 = vector.shape_cast %27 : vector<16xf32> to vector<16x1xf32>
      %cst_21 = arith.constant 3.200000e+01 : f32
      %29 = vector.broadcast %cst_21 : f32 to vector<16x1xf32>
      %30 = arith.divf %28, %29 : vector<16x1xf32>
      %31 = vector.broadcast %23 : vector<16x1xf32> to vector<16x32xf32>
      %32 = arith.subf %19, %31 : vector<16x32xf32>
      %cst_22 = arith.constant 9.99999974E-6 : f32
      %33 = vector.broadcast %cst_22 : f32 to vector<16x1xf32>
      %34 = arith.addf %30, %33 : vector<16x1xf32>
      %35 = math.rsqrt %34 : vector<16x1xf32>
      %36 = vector.broadcast %35 : vector<16x1xf32> to vector<16x32xf32>
      %37 = arith.mulf %32, %36 : vector<16x32xf32>
      %c0_23 = arith.constant 0 : index
      %c0_24 = arith.constant 0 : index
      %38 = vector.load %arg7[%c0_23, %c0_24] : memref<1x32xf32, #tpu.memory_space<vmem>>, vector<1x32xf32>
      %39 = vector.broadcast %38 : vector<1x32xf32> to vector<16x32xf32>
      %40 = arith.mulf %37, %39 : vector<16x32xf32>
      %c0_25 = arith.constant 0 : index
      %c0_26 = arith.constant 0 : index
      %41 = vector.load %arg8[%c0_25, %c0_26] : memref<1x32xf32, #tpu.memory_space<vmem>>, vector<1x32xf32>
      %42 = vector.broadcast %41 : vector<1x32xf32> to vector<16x32xf32>
      %43 = arith.addf %40, %42 : vector<16x32xf32>
      %c0_27 = arith.constant 0 : index
      %c0_28 = arith.constant 0 : index
      %44 = vector.load %arg9[%c0_27, %c0_28] : memref<16x32xf32, #tpu.memory_space<vmem>>, vector<16x32xf32>
      tpu.vector_store %arg9[%c0_27, %c0_28], %43 {strides = array<i32>} : memref<16x32xf32, #tpu.memory_space<vmem>>, vector<16x32xf32>,
    } else {
    }
    return
  }
  func.func @transform_0(%arg0: i32, %arg1: i32) -> (i32, i32) {
    %c0_i32 = arith.constant 0 : i32
    %c0_i32_0 = arith.constant 0 : i32
    return %arg0, %c0_i32 : i32, i32
  }
  func.func @transform_1(%arg0: i32, %arg1: i32) -> (i32, i32) {
    %c0_i32 = arith.constant 0 : i32
    %c0_i32_0 = arith.constant 0 : i32
    return %c0_i32, %arg1 : i32, i32
  }
  func.func @transform_2(%arg0: i32, %arg1: i32) -> (i32, i32) {
    %c0_i32 = arith.constant 0 : i32
    %c0_i32_0 = arith.constant 0 : i32
    return %c0_i32, %arg1 : i32, i32
  }
  func.func @transform_3(%arg0: i32, %arg1: i32) -> (i32, i32) {
    %c0_i32 = arith.constant 0 : i32
    %c0_i32_0 = arith.constant 0 : i32
    return %arg1, %c0_i32 : i32, i32
  }
  func.func @transform_4(%arg0: i32, %arg1: i32) -> (i32, i32) {
    %c0_i32 = arith.constant 0 : i32
    %c0_i32_0 = arith.constant 0 : i32
    %c0_i32_1 = arith.constant 0 : i32
    return %c0_i32, %c0_i32_0 : i32, i32
  }
  func.func @transform_5(%arg0: i32, %arg1: i32) -> (i32, i32) {
    %c0_i32 = arith.constant 0 : i32
    %c0_i32_0 = arith.constant 0 : i32
    %c0_i32_1 = arith.constant 0 : i32
    return %c0_i32, %c0_i32_0 : i32, i32
  }
  func.func @transform_6(%arg0: i32, %arg1: i32) -> (i32, i32) {
    %c0_i32 = arith.constant 0 : i32
    %c0_i32_0 = arith.constant 0 : i32
    %c0_i32_1 = arith.constant 0 : i32
    return %c0_i32, %c0_i32_0 : i32, i32
  }
  func.func @transform_7(%arg0: i32, %arg1: i32) -> (i32, i32) {
    %c0_i32 = arith.constant 0 : i32
    %c0_i32_0 = arith.constant 0 : i32
    return %arg0, %c0_i32 : i32, i32
  }
}

module attributes {stable_mosaic.version = 11 : i64} {
  func.func @_mean_fc_kernel(%arg0: i32, %arg1: i32, %arg2: memref<2x8x32xf32, #tpu.memory_space<vmem>>, %arg3: memref<32x4xf32, #tpu.memory_space<vmem>>, %arg4: memref<1x4xf32, #tpu.memory_space<vmem>>, %arg5: memref<2x4xf32, #tpu.memory_space<vmem>>, %arg6: memref<2x32xf32, #tpu.memory_space<vmem>>) attributes {dimension_semantics = [#tpu.dimension_semantics<parallel>, #tpu.dimension_semantics<arbitrary>], iteration_bounds = array<i64: 1, 1>, scalar_prefetch = 0 : i64, scratch_operands = 1 : i64, tpu.core_type = #tpu.core_type<tc>, window_params = [{transform_indices = @transform_0, window_bounds = array<i64: 2, 8, 32>}, {pipeline_mode = #tpu.pipeline_mode<synchronous>, transform_indices = @transform_1, window_bounds = array<i64: 32, 4>}, {pipeline_mode = #tpu.pipeline_mode<synchronous>, transform_indices = @transform_2, window_bounds = array<i64: 1, 4>}, {transform_indices = @transform_3, window_bounds = array<i64: 2, 4>}]} {
    %c0_i32 = arith.constant 0 : i32
    %0 = arith.cmpi eq, %arg1, %c0_i32 : i32
    %1 = arith.extui %0 : i1 to i32
    %c0_i32_0 = arith.constant 0 : i32
    %2 = arith.cmpi ne, %1, %c0_i32_0 : i32
    scf.if %2 {
      %cst_9 = arith.constant 0.000000e+00 : f32
      %11 = vector.broadcast %cst_9 : f32 to vector<2x32xf32>
      %c0_10 = arith.constant 0 : index
      %c0_11 = arith.constant 0 : index
      %12 = vector.load %arg6[%c0_10, %c0_11] : memref<2x32xf32, #tpu.memory_space<vmem>>, vector<2x32xf32>
      tpu.vector_store %arg6[%c0_10, %c0_11], %11 {strides = array<i32>} : memref<2x32xf32, #tpu.memory_space<vmem>>, vector<2x32xf32>,
    } else {
    }
    %c0 = arith.constant 0 : index
    %c0_1 = arith.constant 0 : index
    %3 = vector.load %arg6[%c0, %c0_1] : memref<2x32xf32, #tpu.memory_space<vmem>>, vector<2x32xf32>
    %c0_2 = arith.constant 0 : index
    %c0_3 = arith.constant 0 : index
    %c0_4 = arith.constant 0 : index
    %4 = vector.load %arg2[%c0_2, %c0_3, %c0_4] : memref<2x8x32xf32, #tpu.memory_space<vmem>>, vector<2x8x32xf32>
    %cst = arith.constant dense<0.000000e+00> : vector<2x32xf32>
    %5 = vector.multi_reduction <add>, %4, %cst [1] : vector<2x8x32xf32> to vector<2x32xf32>
    %6 = arith.addf %3, %5 : vector<2x32xf32>
    %c0_5 = arith.constant 0 : index
    %c0_6 = arith.constant 0 : index
    %7 = vector.load %arg6[%c0_5, %c0_6] : memref<2x32xf32, #tpu.memory_space<vmem>>, vector<2x32xf32>
    tpu.vector_store %arg6[%c0_5, %c0_6], %6 {strides = array<i32>} : memref<2x32xf32, #tpu.memory_space<vmem>>, vector<2x32xf32>,
    %c0_i32_7 = arith.constant 0 : i32
    %8 = arith.cmpi eq, %arg1, %c0_i32_7 : i32
    %9 = arith.extui %8 : i1 to i32
    %c0_i32_8 = arith.constant 0 : i32
    %10 = arith.cmpi ne, %9, %c0_i32_8 : i32
    scf.if %10 {
      %c0_9 = arith.constant 0 : index
      %c0_10 = arith.constant 0 : index
      %11 = vector.load %arg6[%c0_9, %c0_10] : memref<2x32xf32, #tpu.memory_space<vmem>>, vector<2x32xf32>
      %cst_11 = arith.constant 1.250000e-01 : f32
      %12 = vector.broadcast %cst_11 : f32 to vector<2x32xf32>
      %13 = arith.mulf %11, %12 : vector<2x32xf32>
      %c0_12 = arith.constant 0 : index
      %c0_13 = arith.constant 0 : index
      %14 = vector.load %arg3[%c0_12, %c0_13] : memref<32x4xf32, #tpu.memory_space<vmem>>, vector<32x4xf32>
      %cst_14 = arith.constant dense<0.000000e+00> : vector<2x4xf32>
      %15 = tpu.matmul %13, %14, %cst_14 {dimension_numbers = #tpu.dot_dimension_numbers<[1], [0], [0], [1], [0, 0, 1, 1], [], []>} : vector<2x32xf32>, vector<32x4xf32>, vector<2x4xf32> -> vector<2x4xf32>
      %c0_15 = arith.constant 0 : index
      %c0_16 = arith.constant 0 : index
      %16 = vector.load %arg4[%c0_15, %c0_16] : memref<1x4xf32, #tpu.memory_space<vmem>>, vector<1x4xf32>
      %17 = vector.broadcast %16 : vector<1x4xf32> to vector<2x4xf32>
      %18 = arith.addf %15, %17 : vector<2x4xf32>
      %c0_17 = arith.constant 0 : index
      %c0_18 = arith.constant 0 : index
      %19 = vector.load %arg5[%c0_17, %c0_18] : memref<2x4xf32, #tpu.memory_space<vmem>>, vector<2x4xf32>
      tpu.vector_store %arg5[%c0_17, %c0_18], %18 {strides = array<i32>} : memref<2x4xf32, #tpu.memory_space<vmem>>, vector<2x4xf32>,
    } else {
    }
    return
  }
  func.func @transform_0(%arg0: i32, %arg1: i32) -> (i32, i32, i32) {
    %c0_i32 = arith.constant 0 : i32
    %c0_i32_0 = arith.constant 0 : i32
    return %arg0, %arg1, %c0_i32 : i32, i32, i32
  }
  func.func @transform_1(%arg0: i32, %arg1: i32) -> (i32, i32) {
    %c0_i32 = arith.constant 0 : i32
    %c0_i32_0 = arith.constant 0 : i32
    %c0_i32_1 = arith.constant 0 : i32
    return %c0_i32, %c0_i32_0 : i32, i32
  }
  func.func @transform_2(%arg0: i32, %arg1: i32) -> (i32, i32) {
    %c0_i32 = arith.constant 0 : i32
    %c0_i32_0 = arith.constant 0 : i32
    %c0_i32_1 = arith.constant 0 : i32
    return %c0_i32, %c0_i32_0 : i32, i32
  }
  func.func @transform_3(%arg0: i32, %arg1: i32) -> (i32, i32) {
    %c0_i32 = arith.constant 0 : i32
    %c0_i32_0 = arith.constant 0 : i32
    return %arg0, %c0_i32 : i32, i32
  }
}

</mosaic_0001>

<bundles_post_ra>
// kernel: transformer_forward.6
= control target key start
LH: loop header
LB: loop body
LE: loop exit
PB: predicated region body
PF: predicated region fallthrough
CT: control target
= control target key end

     0   :  { %vm38_vm0 = vcmask 261120   ;;  %v229_v42 = vmov 32.0   ;;  %s366_s1 = inlined_call_operand.vmem [shape: f32[32,128], index: 1, kind: input, shape index: {}]   ;;  %s367_s4 = inlined_call_operand.vmem [shape: f32[1,32], index: 4, kind: input, shape index: {}]   ;;  %s368_s3 = inlined_call_operand.vmem [shape: f32[128,32], index: 3, kind: input, shape index: {}]   ;;  %s369_s0 = inlined_call_operand.vmem [shape: f32[16,32], index: 0, kind: input, shape index: {}, may-alias: {0,7}]   ;;  %s370_s2 = inlined_call_operand.vmem [shape: f32[1,128], index: 2, kind: input, shape index: {}]   ;;  %s371_s5 = inlined_call_operand.vmem [shape: f32[1,32], index: 5, kind: input, shape index: {}]   ;;  %s372_s6 = inlined_call_operand.vmem [shape: f32[1,32], index: 6, kind: input, shape index: {}]   ;;  %s373_s7 = inlined_call_operand.vmem [shape: f32[16,32], index: 7, kind: output, shape index: {}, may-alias: {0,7}]  }
   0x1   :  { %v44_v0 = vld [vmem:[%s366_s1 + $0x18] sm:$0xff]  ;;  %v43_v1 = vld [vmem:[%s366_s1 + $0x10] sm:$0xff]  ;;  %v42_v2 = vld [vmem:[%s366_s1 + $0x8] sm:$0xff]  ;;  %223 = vrcp.f32 %v229_v42 }
   0x2   :  { %68 = vmatpush.msra.mxu0 %v44_v0  ;;  %v219_v3 = vld [vmem:[%s367_s4] ss:$0 sm:$0xff]  ;;  %v98_v4 = vld [vmem:[%s368_s3 + $0x78] sm:$0xff]  ;;  %v27_v6 = vld [vmem:[%s369_s0 + $0x8] sm:$0xff] }
   0x3   :  { %v26_v5 = vld [vmem:[%s369_s0] sm:$0xff]  ;;  %99 = vmatpush.msra.mxu1 %v98_v4  ;;  %v97_v7 = vld [vmem:[%s368_s3 + $0x70] sm:$0xff]  ;;  %v37_v10 = vadd.f32 %v219_v3, %v27_v6  ;;  %v96_v11 = vld [vmem:[%s368_s3 + $0x68] sm:$0xff]  ;;  %202 = vmatpush.msra.mxu2 %v98_v4 }
   0x4   :  { %69 = vmatpush.msra.mxu0 %v43_v1  ;;  %v41_v8 = vld [vmem:[%s366_s1] sm:$0xff]  ;;  %v36_v9 = vadd.f32 %v219_v3, %v26_v5  ;;  %v94_v13 = vld [vmem:[%s368_s3 + $0x58] sm:$0xff]  ;;  %v93_v14 = vld [vmem:[%s368_s3 + $0x50] sm:$0xff] }
   0x5   :  { %100 = vmatpush.msra.mxu1 %v97_v7  ;;  %v95_v12 = vld [vmem:[%s368_s3 + $0x60] sm:$0xff]  ;;  %203 = vmatpush.msra.mxu2 %v97_v7  ;;  %40 = vst.msk [vmem:[#allocation2 + $0x8] sm:$0xff] %vm38_vm0, %v37_v10  ;;  %v92_v15 = vld [vmem:[%s368_s3 + $0x48] sm:$0xff]  ;;  %v90_v17 = vld [vmem:[%s368_s3 + $0x38] sm:$0xff] }
   0x6   :  { %70 = vmatpush.msra.mxu0 %v42_v2  ;;  %39 = vst.msk [vmem:[#allocation2] sm:$0xff] %vm38_vm0, %v36_v9  ;;  %v91_v16 = vld [vmem:[%s368_s3 + $0x40] sm:$0xff]  ;;  %v89_v18 = vld [vmem:[%s368_s3 + $0x30] sm:$0xff]  ;;  %v88_v19 = vld [vmem:[%s368_s3 + $0x28] sm:$0xff] }
   0x7   :  { %101 = vmatpush.msra.mxu1 %v96_v11  ;;  %204 = vmatpush.msra.mxu2 %v96_v11  ;;  %v87_v20 = vld [vmem:[%s368_s3 + $0x20] sm:$0xff]  ;;  %v86_v21 = vld [vmem:[%s368_s3 + $0x18] sm:$0xff]  ;;  %v85_v22 = vld [vmem:[%s368_s3 + $0x10] sm:$0xff]  ;;  %v224_v43 = vpop.eup %223 }
   0x8   :  { %71 = vmatpush.msra.mxu0 %v41_v8  ;;  %v84_v23 = vld [vmem:[%s368_s3 + $0x8] sm:$0xff]  ;;  %v83_v24 = vld [vmem:[%s368_s3] sm:$0xff]  ;;  %v138_v44 = vmul.f32 32.0, %v224_v43  ;;  %vm142_vm1 = vweird.f32 %v224_v43 }
   0x9   :  { %200 = vmatmul.msk.f32.vlgmr.msra.gmra.mxu0 %vm38_vm0, %v26_v5  ;;  %102 = vmatpush.msra.mxu1 %v95_v12  ;;  %v220_v25 = vld [vmem:[%s370_s2] ss:$0 sm:$0xff] }
   0xa   :  { %205 = vmatpush.msra.mxu2 %v95_v12  ;;  %v139_v45 = vsub.f32 1.0, %v138_v44  ;;  %v221_v7 = vld [vmem:[%s371_s5] ss:$0 sm:$0xff] }
   0xb   :  { %103 = vmatpush.msra.mxu1 %v94_v13  ;;  %v222_v9 = vld [vmem:[%s372_s6] ss:$0 sm:$0xff] }
   0xc   :  { %206 = vmatpush.msra.mxu2 %v94_v13  ;;  %v82_v37 = vld [vmem:[#allocation2 + $0x8] sm:$0xff]  ;;  %v140_v46 = vmul.f32 %v224_v43, %v139_v45 }
   0xd   :  { %104 = vmatpush.msra.mxu1 %v93_v14  ;;  %v81_v32 = vld [vmem:[#allocation2] sm:$0xff] }
   0xe   :  { %207 = vmatpush.msra.mxu2 %v93_v14  ;;  %v141_v47 = vadd.f32 %v224_v43, %v140_v46 }
   0xf   :  { %105 = vmatpush.msra.mxu1 %v92_v15 }
  0x10   :  { %208 = vmatpush.msra.mxu2 %v92_v15  ;;  %v143_v48 = vsel %vm142_vm1, %v224_v43, %v141_v47 }
  0x11   :  { %201 = vmatmul.msk.f32.gmra.mxu0 %vm38_vm0, %v27_v6  ;;  %106 = vmatpush.msra.mxu1 %v91_v16 }
  0x12   :  { %209 = vmatpush.msra.mxu2 %v91_v16 }
  0x13   :  { %107 = vmatpush.msra.mxu1 %v90_v17 }
  0x14   :  { %210 = vmatpush.msra.mxu2 %v90_v17 }
  0x15   :  { %108 = vmatpush.msra.mxu1 %v89_v18 }
  0x16   :  { %211 = vmatpush.msra.mxu2 %v89_v18 }
  0x17   :  { %109 = vmatpush.msra.mxu1 %v88_v19 }
  0x18   :  { %212 = vmatpush.msra.mxu2 %v88_v19 }
  0x19   :  { %110 = vmatpush.msra.mxu1 %v87_v20 }
  0x1a   :  { %213 = vmatpush.msra.mxu2 %v87_v20 }
  0x1b   :  { %111 = vmatpush.msra.mxu1 %v86_v21 }
  0x1c   :  { %214 = vmatpush.msra.mxu2 %v86_v21 }
  0x1d   :  { %112 = vmatpush.msra.mxu1 %v85_v22 }
  0x1e   :  { %215 = vmatpush.msra.mxu2 %v85_v22 }
  0x1f   :  { %113 = vmatpush.msra.mxu1 %v84_v23 }
  0x20   :  { %216 = vmatpush.msra.mxu2 %v84_v23 }
  0x21   :  { %114 = vmatpush.msra.mxu1 %v83_v24 }
  0x22   :  { %217 = vmatpush.msra.mxu2 %v83_v24 }
  0x86   :  { %v73_v26 = vpop.f32.mrf.mxu0 }
  0x87   :  { %v74_v27 = vadd.f32 %v220_v25, %v73_v26 }
  0x89   :  { %v79_v28 = vmax.f32 %v74_v27, 0.0 }
  0x8b   :  { %115 = vmatmul.f32.vlgmr.msra.gmra.mxu1 %v79_v28 }
  0x8e   :  { %v76_v29 = vpop.f32.mrf.mxu0 }
  0x8f   :  { %v77_v30 = vadd.f32 %v220_v25, %v76_v29 }
  0x91   :  { %v80_v31 = vmax.f32 %v77_v30, 0.0 }
  0x93   :  { %118 = vmatmul.f32.vlgmr.msra.gmra.mxu2 %v80_v31 }
 0x108   :  { %v116_v33 = vpop.f32.mrf.mxu1 }
 0x109   :  { %v122_v34 = vadd.f32 %v116_v33, %v81_v32 }
 0x10b   :  { %124 = vst.msk [vmem:[#allocation2] sm:$0xff] %vm38_vm0, %v122_v34 }
 0x112   :  { %v129_v35 = vld [vmem:[#allocation2] sm:$0xff] }
 0x113   :  { %v131_v36 = vsel %vm38_vm0, %v129_v35, 0.0 }
 0x114   :  { %132 = vadd.xlane.f32.xlu0 %v131_v36 }
 0x116   :  { %v119_v38 = vpop.f32.mrf.mxu2 }
 0x117   :  { %v123_v39 = vadd.f32 %v119_v38, %v82_v37 }
 0x119   :  { %125 = vst.msk [vmem:[#allocation2 + $0x8] sm:$0xff] %vm38_vm0, %v123_v39 }
 0x120   :  { %v130_v40 = vld [vmem:[#allocation2 + $0x8] sm:$0xff] }
 0x121   :  { %v134_v41 = vsel %vm38_vm0, %v130_v40, 0.0 }
 0x122   :  { %135 = vadd.xlane.f32.xlu0 %v134_v41 }
 0x187   :  { %v133_v49 = vpop.xlane.xlu0 %132 }
 0x188   :  { %v144_v50 = vmul.f32 %v143_v48, %v133_v49 }
 0x18a   :  { %v146_v51 = vsub.f32 %v129_v35, %v144_v50 }
 0x18c   :  { %v148_v52 = vmul.f32 %v146_v51, %v146_v51 }
 0x18e   :  { %v150_v53 = vsel %vm38_vm0, %v148_v52, 0.0 }
 0x18f   :  { %151 = vadd.xlane.f32.xlu1 %v150_v53 }
 0x195   :  { %v136_v54 = vpop.xlane.xlu0 %135 }
 0x196   :  { %v145_v55 = vmul.f32 %v143_v48, %v136_v54 }
 0x198   :  { %v147_v56 = vsub.f32 %v130_v40, %v145_v55 }
 0x19a   :  { %v149_v57 = vmul.f32 %v147_v56, %v147_v56 }
 0x19c   :  { %v153_v58 = vsel %vm38_vm0, %v149_v57, 0.0 }
 0x19d   :  { %154 = vadd.xlane.f32.xlu1 %v153_v58 }
 0x202   :  { %v152_v59 = vpop.xlane.xlu1 %151 }
 0x203   :  { %v156_v60 = vmul.f32 %v152_v59, %v143_v48 }
 0x205   :  { %v158_v61 = vadd.f32 1e-05, %v156_v60 }
 0x207   :  { %225 = vrsqrt.f32 %v158_v61  ;;  %vm166_vm3 = vweird.f32 %v158_v61 }
 0x20d   :  { %v226_v62 = vpop.eup %225 }
 0x20e   :  { %v161_v63 = vmul.f32 %v226_v62, %v158_v61  ;;  %vm167_vm2 = vweird.f32 %v226_v62 }
 0x20f   :  { %vm168_vm4 = vmor %vm166_vm3, %vm167_vm2 }
 0x210   :  { %v162_v0 = vmul.f32 %v226_v62, %v161_v63  ;;  %v155_v1 = vpop.xlane.xlu1 %154 }
 0x211   :  { %v157_v2 = vmul.f32 %v155_v1, %v143_v48 }
 0x212   :  { %v163_v3 = vmul.f32 0.5, %v162_v0 }
 0x213   :  { %v159_v4 = vadd.f32 1e-05, %v157_v2 }
 0x214   :  { %v164_v5 = vsub.f32 1.5, %v163_v3 }
 0x215   :  { %227 = vrsqrt.f32 %v159_v4  ;;  %vm176_vm6 = vweird.f32 %v159_v4 }
 0x216   :  { %v165_v6 = vmul.f32 %v226_v62, %v164_v5 }
 0x218   :  { %v169_v8 = vsel %vm168_vm4, %v226_v62, %v165_v6 }
 0x219   :  { %v180_v10 = vmul.f32 %v169_v8, %v146_v51 }
 0x21b   :  { %v228_v11 = vpop.eup %227  ;;  %v186_v12 = vmul.f32 %v221_v7, %v180_v10 }
 0x21c   :  { %v171_v13 = vmul.f32 %v228_v11, %v159_v4  ;;  %vm177_vm5 = vweird.f32 %v228_v11 }
 0x21d   :  { %v192_v14 = vadd.f32 %v222_v9, %v186_v12  ;;  %vm178_vm7 = vmor %vm176_vm6, %vm177_vm5 }
 0x21e   :  { %v172_v15 = vmul.f32 %v228_v11, %v171_v13 }
 0x21f   :  { %194 = vst.msk [vmem:[%s373_s7] sm:$0xff] %vm38_vm0, %v192_v14 }
 0x220   :  { %v173_v16 = vmul.f32 0.5, %v172_v15 }
 0x222   :  { %v174_v17 = vsub.f32 1.5, %v173_v16 }
 0x224   :  { %v175_v18 = vmul.f32 %v228_v11, %v174_v17 }
 0x226   :  { %v179_v19 = vsel %vm178_vm7, %v228_v11, %v175_v18 }
 0x227   :  { %v181_v20 = vmul.f32 %v179_v19, %v147_v56 }
 0x229   :  { %v187_v21 = vmul.f32 %v221_v7, %v181_v20 }
 0x22b   :  { %v193_v22 = vadd.f32 %v222_v9, %v187_v21 }
 0x22d   :  { %195 = vst.msk [vmem:[%s373_s7 + $0x8] sm:$0xff] %vm38_vm0, %v193_v22 }

// kernel: transformer_forward.9
= control target key start
LH: loop header
LB: loop body
LE: loop exit
PB: predicated region body
PF: predicated region fallthrough
CT: control target
= control target key end

     0   :  { %vm19_vm0 = vcmask 254976   ;;  %vm24_vm1 = vcmask 261120   ;;  %v131_v2 = vmov 0.0   ;;  %s182_s0 = inlined_call_operand.vmem [shape: f32[2,8,32], index: 0, kind: input, shape index: {}]   ;;  %s183_s1 = inlined_call_operand.vmem [shape: f32[32,4], index: 1, kind: input, shape index: {}]   ;;  %s184_s2 = inlined_call_operand.vmem [shape: f32[1,4], index: 2, kind: input, shape index: {}]   ;;  %s185_s3 = inlined_call_operand.hbm [shape: f32[2,4], index: 3, kind: output, shape index: {}]  }
   0x1   :  { %v55_v0 = vld [vmem:[%s183_s1 + $0x18] sm:$0xff]  ;;  %v54_v1 = vld [vmem:[%s183_s1 + $0x10] sm:$0xff]  ;;  %20 = vst.msk [vmem:[#allocation2] sm:$0x3] %vm19_vm0, %v131_v2  ;;  %v22_v3 = vld [vmem:[%s182_s0] sm:$0xff] }
   0x2   :  { %75 = vmatpush.msra.mxu0 %v55_v0  ;;  %v23_v4 = vld [vmem:[%s182_s0 + $0x8] sm:$0xff]  ;;  %v25_v6 = vsel %vm24_vm1, %v22_v3, 0.0 }
   0x3   :  { %v53_v5 = vld [vmem:[%s183_s1 + $0x8] sm:$0xff]  ;;  %v32_v7 = vsel %vm24_vm1, %v23_v4, 0.0  ;;  %v26_v8 = vrot.slane %v25_v6, 4 }
   0x4   :  { %76 = vmatpush.msra.mxu0 %v54_v1  ;;  %v33_v9 = vrot.slane %v32_v7, 4 }
   0x5   :  { %8 = vsyncpa [#allocation4], 0  ;;  %v52_v10 = vld [vmem:[%s183_s1] sm:$0xff]  ;;  %v27_v11 = vadd.f32 %v26_v8, %v25_v6  ;;  %vm41_vm2 = vcmask 1041409   ;;  %s132_s24 = smov [#allocation3]   ;;  %s92_s28 = sshll.u32 %s185_s3, 4  ;;  %s93_s28 = int_to_ptr.hbm [resolvable:$true] %s92_s28 }
   0x6   :  { %77 = vmatpush.msra.mxu0 %v53_v5  ;;  %v34_v12 = vadd.f32 %v33_v9, %v32_v7  ;;  %v104_v26 = vld [vmem:[%s184_s2] ss:$0 sm:$0xff]  ;;  %s90_s25 = sshll.u32 %s132_s24, 4  ;;  %vm83_vm3 = vcmask 25600   ;;  %s91_s25 = int_to_ptr.vmem [resolvable:$true] %s90_s25 }
   0x7   :  { %v28_v13 = vrot.slane %v27_v11, 2 }
   0x8   :  { %78 = vmatpush.msra.mxu0 %v52_v10  ;;  %v35_v14 = vrot.slane %v34_v12, 2  ;;  %v21_v19 = vld [vmem:[#allocation2] sm:$0x3] }
   0x9   :  { %v29_v15 = vadd.f32 %v28_v13, %v27_v11 }
   0xa   :  { %v36_v16 = vadd.f32 %v35_v14, %v34_v12 }
   0xb   :  { %v30_v17 = vrot.slane %v29_v15, 1 }
   0xc   :  { %v37_v18 = vrot.slane %v36_v16, 1 }
   0xd   :  { %v31_v20 = vadd.f32 %v30_v17, %v29_v15 }
   0xe   :  { %v38_v21 = vadd.f32 %v37_v18, %v36_v16 }
  0x10   :  { %v42_v22 = vsel %vm41_vm2, %v38_v21, %v31_v20 }
  0x11   :  { %v44_v23 = vadd.f32 %v42_v22, %v21_v19 }
  0x13   :  { %46 = vst.msk [vmem:[#allocation2] sm:$0x3] %vm19_vm0, %v44_v23 }
  0x1a   :  { %v50_v24 = vld [vmem:[#allocation2] sm:$0x3] }
  0x1b   :  { %v51_v25 = vmul.f32 0.125, %v50_v24 }
  0x1d   :  { %101 = vmatmul.msk.f32.vlgmr.msra.gmra.mxu0 %vm24_vm1, %v51_v25 }
  0x9a   :  { %v80_v27 = vpop.f32.mrf.mxu0 }
  0x9b   :  { %v81_v28 = vadd.f32 %v104_v26, %v80_v27 }
  0x9d   :  { %84 = vst.msk [vmem:[#allocation3] sm:$0x3] %vm83_vm3, %v81_v28 }
  0x9e   :  { %95 = dma.vmem_to_hbm [thread:$0]  %s91_s25, 32, %s93_s28, [#allocation4]  }
  0x9f   :  { %129 = dma.done.wait [#allocation4], 32  }
  0xa0   :  { %130 = vsyncadd [#allocation4], 4294967264 }
  0xa1   :  { %100 = vsyncpa [#allocation4], 1 }

// kernel: transformer_forward.5
= control target key start
LH: loop header
LB: loop body
LE: loop exit
PB: predicated region body
PF: predicated region fallthrough
CT: control target
= control target key end

     0   :  { %s875_s24 = smov 0   ;;  %s992_s0 = inlined_call_operand.vmem [shape: f32[2,8,32], index: 0, kind: input, shape index: {}, may-alias: {0,7}]   ;;  %s993_s1 = inlined_call_operand.vmem [shape: f32[32,96], index: 1, kind: input, shape index: {}]   ;;  %s994_s2 = inlined_call_operand.vmem [shape: f32[32,32], index: 2, kind: input, shape index: {}]   ;;  %s995_s3 = inlined_call_operand.vmem [shape: f32[1,32], index: 3, kind: input, shape index: {}]   ;;  %s996_s4 = inlined_call_operand.vmem [shape: s32[2,1,8], index: 4, kind: input, shape index: {}]   ;;  %s997_s5 = inlined_call_operand.vmem [shape: f32[1,32], index: 5, kind: input, shape index: {}]   ;;  %s998_s6 = inlined_call_operand.vmem [shape: f32[1,32], index: 6, kind: input, shape index: {}]   ;;  %s999_s7 = inlined_call_operand.vmem [shape: f32[2,8,32], index: 7, kind: output, shape index: {}, may-alias: {0,7}]  }
   0x1 LB: > { %s741_s25 = sadd.s32 4294967295, %s817_s24   ;;  %p745_p0 = scmp.ge.s32.totalorder %s817_s24, 1  ;;  %s817_s24 = sphi %s875_s24, %s17_s24  }
   0x2   : > { %p244_p1 = scmp.lt.s32.totalorder %s817_s24, 3 }
   0x4   : > { %p245_p2 = pnand %p745_p0, %p244_p1 }
   0x5   : > { %p277_p3 = scmp.lt.s32.totalorder (!%p245_p2), %s741_s25, 1  ;;  %s819_s15 = smov (!%p245_p2), 72  }
   0x6   : > { %248 = sbr.rel (%p245_p2) target bundleno = 1332 (0x534), region = 48  ;;  %s820_s16 = smov (!%p245_p2), 120  }
   0x7   : > { %s821_s17 = smov (!%p245_p2), 96   ;;  %s822_s18 = smov (!%p245_p2), 112  }
   0x8   : > { %s823_s19 = smov (!%p245_p2), 80   ;;  %s824_s20 = smov (!%p245_p2), 88  }
   0x9   : > { %s825_s21 = smov (!%p245_p2), 104   ;;  %s827_s27 = smov (!%p245_p2), 64  }
   0xa   : > { %s828_s28 = smov (!%p245_p2), 40   ;;  %s829_s29 = smov (!%p245_p2), 56  }
   0xb   : > { %v292_v0 = vld [vmem:[%s993_s1 + $0x18] sm:$0xff]  ;;  %v291_v1 = vld [vmem:[%s993_s1 + $0x10] sm:$0xff]  ;;  %v290_v2 = vld [vmem:[%s993_s1 + $0x8] sm:$0xff]  ;;  %s1003_s25 = smov (!%p277_p3, %s741_s25), 1  ;;  %vm293_vm0 = vcmask 261120   ;;  %vm321_vm1 = vcmask 64512  }
   0xc   : > { %309 = vmatpush.msra.mxu0 %v292_v0  ;;  %v289_v3 = vld [vmem:[%s993_s1] sm:$0xff]  ;;  %s746_s11 = sshll.u32 %s1003_s25, 3  ;;  %s283_s26 = scalar_lea.vmem %s996_s4, %s1003_s25  ;;  %v826_v14 = vmov 0   ;;  %vm603_vm4 = vcmask 130048   ;;  %vm605_vm5 = vcmask 195584  }
   0xd   : > { %s280_s14 = scalar_lea.vmem %s992_s0, %s746_s11  ;;  %v317_v13 = vld [vmem:[%s283_s26] sm:$0x1]  ;;  %s830_s30 = smov 48  }
   0xe   : > { %310 = vmatpush.msra.mxu0 %v291_v1  ;;  %v903_v4 = vld [vmem:[%s280_s14] sm:$0xff]  ;;  %vm346_vm2 = vcmp.eq.s32.totalorder %v317_v13, 0  ;;  %s831_s8 = smov 16   ;;  %s832_s9 = smov 8   ;;  %v608_v13 = vld [vmem:[%s994_s2 + $0x8] sm:$0xff] }
   0xf   : > { %v347_v15 = vsel %vm346_vm2, 1, %v826_v14  ;;  %s833_s10 = smov 24   ;;  %v607_v14 = vld [vmem:[%s994_s2] sm:$0xff] }
  0x10   : > { %311 = vmatpush.msra.mxu0 %v290_v2  ;;  %v348_v16 = vperm.slane %v347_v15, 0 }
  0x12   : > { %312 = vmatpush.msra.mxu0 %v289_v3  ;;  %vm929_vm3 = vcmp.eq.s32.totalorder %v348_v16, 1 }
  0x13   : > { %748 = vmatmul.msk.f32.vlgmr.msra.gmra.mxu0 %vm293_vm0, %v903_v4 }
  0x90   : > { %v907_v5 = vpop.f32.mrf.mxu0 }
  0x91   : > { %525 = vrot.lane.b32.xlu2 %v907_v5, %s819_s15  ;;  %389 = vrot.lane.b32.xlu1 %v907_v5, %s820_s16 }
  0x92   : > { %319 = vrot.lane.b32.xlu0 %v907_v5, %s821_s17 }
  0x99   : > { %456 = vrot.lane.b32.xlu2 %v907_v5, %s822_s18  ;;  %458 = vrot.lane.b32.xlu1 %v907_v5, %s823_s19 }
  0x9a   : > { %391 = vrot.lane.b32.xlu0 %v907_v5, %s824_s20 }
  0xa2   : > { %523 = vrot.lane.b32.xlu0 %v907_v5, %s825_s21 }
  0xeb   : > { %v526_v6 = vpop.permute.xlu2 %525 }
  0xec   : > { %758 = vmatpush.xpose.msk.msrb.mxu0 %vm321_vm1, %v526_v6 }
  0xf3   : > { %v457_v11 = vpop.permute.xlu2 %456 }
 0x103   : > { %v390_v7 = vpop.permute.xlu1 %389 }
 0x104   : > { %v320_v8 = vpop.permute.xlu0 %319 }
 0x105   : > { %749 = vmatpush.xpose.msk.msra.mxu1 %vm321_vm1, %v320_v8 }
 0x108   : > { %750 = vmatmul.msk.f32.vlgmr.msra.gmra.mxu1 %vm321_vm1, %v907_v5 }
 0x10b   : > { %v459_v9 = vpop.permute.xlu1 %458 }
 0x10c   : > { %v392_v10 = vpop.permute.xlu0 %391  ;;  %755 = vmatpush.xpose.msk.msrb.mxu1 %vm321_vm1, %v459_v9 }
 0x10d   : > { %752 = vmatpush.xpose.msk.msra.mxu3 %vm321_vm1, %v392_v10 }
 0x110   : > { %753 = vmatmul.msk.f32.vlgmr.msra.gmra.mxu3 %vm321_vm1, %v390_v7  ;;  %756 = vmatmul.msk.f32.vlgmr.msrb.gmra.mxu1 %vm321_vm1, %v457_v11  ;;  %v610_v11 = vld [vmem:[%s994_s2 + $0x18] sm:$0xff] }
 0x111   : > { %630 = vmatpush.msra.mxu1 %v610_v11 }
 0x114   : > { %v524_v12 = vpop.permute.xlu0 %523 }
 0x115   : > { %759 = vmatmul.msk.f32.vlgmr.msrb.gmra.mxu0 %vm321_vm1, %v524_v12  ;;  %v609_v12 = vld [vmem:[%s994_s2 + $0x10] sm:$0xff] }
 0x116   : > { %631 = vmatpush.msra.mxu1 %v609_v12 }
 0x118   : > { %632 = vmatpush.msra.mxu1 %v608_v13 }
 0x11a   : > { %633 = vmatpush.msra.mxu1 %v607_v14 }
 0x185   : > { %v343_v18 = vpop.f32.mrf.mxu1 }
 0x186   : > { %v350_v19 = vsel %vm929_vm3, -1e+20, %v343_v18 }
 0x187   : > { %v351_v20 = vmul.f32 0.17677669, %v350_v19 }
 0x189   : > { %v352_v21 = vsel %vm321_vm1, %v351_v20, -inf }
 0x18a   : > { %353 = vmax.xlane.f32.xlu1 %v352_v21  ;;  %v788_v21 = vld [vmem:[%s995_s3] ss:$0 sm:$0xff] }
 0x18d   : > { %v481_v22 = vpop.f32.mrf.mxu1 }
 0x18e   : > { %v484_v23 = vsel %vm929_vm3, -1e+20, %v481_v22 }
 0x18f   : > { %v485_v24 = vmul.f32 0.17677669, %v484_v23 }
 0x191   : > { %v486_v25 = vsel %vm321_vm1, %v485_v24, -inf }
 0x192   : > { %487 = vmax.xlane.f32.xlu0 %v486_v25  ;;  %v548_v28 = vpop.f32.mrf.mxu0 }
 0x193   : > { %v414_v26 = vpop.f32.mrf.mxu3  ;;  %v551_v31 = vsel %vm929_vm3, -1e+20, %v548_v28 }
 0x194   : > { %v417_v27 = vsel %vm929_vm3, -1e+20, %v414_v26  ;;  %v552_v32 = vmul.f32 0.17677669, %v551_v31  ;;  %v834_v26 = vmov 32.0  }
 0x195   : > { %v418_v29 = vmul.f32 0.17677669, %v417_v27 }
 0x196   : > { %v553_v33 = vsel %vm321_vm1, %v552_v32, -inf }
 0x197   : > { %v419_v30 = vsel %vm321_vm1, %v418_v29, -inf }
 0x198   : > { %420 = vmax.xlane.f32.xlu2 %v419_v30 }
 0x1a0   : > { %554 = vmax.xlane.f32.xlu2 %v553_v33 }
 0x1a6   : > { %363 = vrot.lane.b32.xlu0 %v907_v5, %s827_s27 }
 0x1ae   : > { %564 = vrot.lane.b32.xlu0 %v907_v5, %s828_s28 }
 0x1fd   : > { %v354_v34 = vpop.xlane.xlu1 %353 }
 0x1fe   : > { %v355_v35 = vsub.f32 %v351_v20, %v354_v34 }
 0x200   : > { %v356_v36 = vmul.f32 1.442695, %v355_v35 }
 0x202   : > { %791 = vpow2.f32 %v356_v36 }
 0x205   : > { %v488_v37 = vpop.xlane.xlu0 %487 }
 0x206   : > { %v489_v38 = vsub.f32 %v485_v24, %v488_v37 }
 0x208   : > { %v792_v39 = vpop.eup %791  ;;  %v490_v40 = vmul.f32 1.442695, %v489_v38 }
 0x209   : > { %v358_v41 = vsel %vm321_vm1, %v792_v39, 0.0 }
 0x20a   : > { %793 = vpow2.f32 %v490_v40  ;;  %359 = vadd.xlane.f32.xlu1 %v358_v41 }
 0x20b   : > { %v421_v42 = vpop.xlane.xlu2 %420 }
 0x20c   : > { %v422_v47 = vsub.f32 %v418_v29, %v421_v42 }
 0x20e   : > { %v423_v50 = vmul.f32 1.442695, %v422_v47 }
 0x210   : > { %v794_v43 = vpop.eup %793 }
 0x211   : > { %v492_v44 = vsel %vm321_vm1, %v794_v43, 0.0 }
 0x212   : > { %493 = vadd.xlane.f32.xlu1 %v492_v44 }
 0x213   : > { %v555_v45 = vpop.xlane.xlu2 %554 }
 0x214   : > { %v556_v46 = vsub.f32 %v552_v32, %v555_v45 }
 0x216   : > { %v557_v48 = vmul.f32 1.442695, %v556_v46  ;;  %v789_v46 = vld [vmem:[%s997_s5] ss:$0 sm:$0xff] }
 0x218   : > { %795 = vpow2.f32 %v557_v48  ;;  %v364_v49 = vpop.permute.xlu0 %363  ;;  %v790_v48 = vld [vmem:[%s998_s6] ss:$0 sm:$0xff] }
 0x219   : > { %384 = vmatpush.msra.mxu2 %v364_v49  ;;  %797 = vpow2.f32 %v423_v50 }
 0x21e   : > { %v796_v51 = vpop.eup %795 }
 0x21f   : > { %v559_v52 = vsel %vm321_vm1, %v796_v51, 0.0  ;;  %v798_v53 = vpop.eup %797 }
 0x220   : > { %560 = vadd.xlane.f32.xlu2 %v559_v52  ;;  %v425_v54 = vsel %vm321_vm1, %v798_v53, 0.0  ;;  %v565_v62 = vpop.permute.xlu0 %564 }
 0x228   : > { %426 = vadd.xlane.f32.xlu2 %v425_v54 }
 0x22b   : > { %430 = vrot.lane.b32.xlu1 %v907_v5, %s829_s29 }
 0x240   : > { %497 = vrot.lane.b32.xlu2 %v907_v5, %s830_s30  ;;  %s287_s30 = scalar_lea.vmem %s999_s7, %s746_s11 }
 0x27d   : > { %v360_v55 = vpop.xlane.xlu1 %359 }
 0x27e   : > { %799 = vrcp.f32 %v360_v55 }
 0x284   : > { %v800_v56 = vpop.eup %799 }
 0x285   : > { %v362_v57 = vmul.f32 %v800_v56, %v792_v39  ;;  %v494_v59 = vpop.xlane.xlu1 %493 }
 0x286   : > { %801 = vrcp.f32 %v494_v59 }
 0x287   : > { %751 = vmatmul.msk.f32.vlgmr.msra.gmra.mxu2 %vm321_vm1, %v362_v57 }
 0x28c   : > { %v802_v63 = vpop.eup %801 }
 0x28d   : > { %v496_v3 = vmul.f32 %v802_v63, %v794_v43 }
 0x293   : > { %v561_v58 = vpop.xlane.xlu2 %560 }
 0x29b   : > { %v427_v60 = vpop.xlane.xlu2 %426 }
 0x29c   : > { %803 = vrcp.f32 %v427_v60 }
 0x29d   : > { %v431_v61 = vpop.permute.xlu1 %430  ;;  %805 = vrcp.f32 %v561_v58 }
 0x29e   : > { %451 = vmatpush.msrb.mxu2 %v431_v61  ;;  %807 = vrcp.f32 %v834_v26 }
 0x2a0   : > { %585 = vmatpush.msra.mxu2 %v565_v62 }
 0x2a2   : > { %v804_v0 = vpop.eup %803 }
 0x2a3   : > { %v498_v1 = vpop.permute.xlu2 %497  ;;  %v429_v2 = vmul.f32 %v804_v0, %v798_v53  ;;  %v806_v5 = vpop.eup %805 }
 0x2a4   : > { %518 = vmatpush.msrb.mxu3 %v498_v1  ;;  %v563_v6 = vmul.f32 %v806_v5, %v796_v51  ;;  %v808_v27 = vpop.eup %807 }
 0x2a5   : > { %754 = vmatmul.msk.f32.vlgmr.msrb.gmra.mxu2 %vm321_vm1, %v429_v2  ;;  %757 = vmatmul.msk.f32.vlgmr.msrb.gmra.mxu3 %vm321_vm1, %v496_v3  ;;  %v643_v28 = vmul.f32 32.0, %v808_v27  ;;  %vm647_vm6 = vweird.f32 %v808_v27 }
 0x2a7   : > { %v644_v29 = vsub.f32 1.0, %v643_v28 }
 0x2a9   : > { %v645_v30 = vmul.f32 %v808_v27, %v644_v29 }
 0x2ab   : > { %v646_v31 = vadd.f32 %v808_v27, %v645_v30 }
 0x2ad   : > { %760 = vmatmul.msk.f32.vlgmr.msra.gmra.mxu2 %vm321_vm1, %v563_v6  ;;  %v648_v32 = vsel %vm647_vm6, %v808_v27, %v646_v31 }
 0x30a   : > { %v386_v7 = vpop.f32.mrf.mxu2 }
 0x328   : > { %v453_v8 = vpop.f32.mrf.mxu2  ;;  %v520_v9 = vpop.f32.mrf.mxu3 }
 0x329   : > { %595 = vrot.lane.b32.xlu1 %v520_v9, %s831_s8  ;;  %591 = vrot.lane.b32.xlu0 %v453_v8, %s832_s9 }
 0x330   : > { %v587_v10 = vpop.f32.mrf.mxu2 }
 0x331   : > { %599 = vrot.lane.b32.xlu0 %v587_v10, %s833_s10 }
 0x39b   : > { %v592_v15 = vpop.permute.xlu0 %591  ;;  %v596_v16 = vpop.permute.xlu1 %595 }
 0x39c   : > { %v602_v17 = vsel %vm321_vm1, %v386_v7, %v592_v15 }
 0x39d   : > { %v604_v18 = vsel %vm603_vm4, %v602_v17, %v596_v16 }
 0x3a3   : > { %v600_v19 = vpop.permute.xlu0 %599 }
 0x3a4   : > { %v606_v20 = vsel %vm605_vm5, %v604_v18, %v600_v19 }
 0x3a5   : > { %761 = vmatmul.msk.f32.vlgmr.msra.gmra.mxu1 %vm293_vm0, %v606_v20 }
 0x422   : > { %v635_v22 = vpop.f32.mrf.mxu1 }
 0x423   : > { %v636_v23 = vadd.f32 %v788_v21, %v635_v22 }
 0x425   : > { %v638_v24 = vadd.f32 %v636_v23, %v903_v4 }
 0x427   : > { %v639_v25 = vsel %vm293_vm0, %v638_v24, 0.0 }
 0x428   : > { %640 = vadd.xlane.f32.xlu2 %v639_v25 }
 0x49b   : > { %v641_v33 = vpop.xlane.xlu2 %640 }
 0x49c   : > { %v649_v34 = vmul.f32 %v648_v32, %v641_v33 }
 0x49e   : > { %v650_v35 = vsub.f32 %v638_v24, %v649_v34 }
 0x4a0   : > { %v651_v36 = vmul.f32 %v650_v35, %v650_v35 }
 0x4a2   : > { %v652_v37 = vsel %vm293_vm0, %v651_v36, 0.0 }
 0x4a3   : > { %653 = vadd.xlane.f32.xlu1 %v652_v37 }
 0x516   : > { %v654_v4 = vpop.xlane.xlu1 %653 }
 0x517   : > { %v655_v38 = vmul.f32 %v654_v4, %v648_v32 }
 0x519   : > { %v656_v39 = vadd.f32 1e-05, %v655_v38 }
 0x51b   : > { %809 = vrsqrt.f32 %v656_v39  ;;  %vm663_vm8 = vweird.f32 %v656_v39 }
 0x521   : > { %v810_v40 = vpop.eup %809 }
 0x522   : > { %v658_v41 = vmul.f32 %v810_v40, %v656_v39  ;;  %vm664_vm7 = vweird.f32 %v810_v40 }
 0x523   : > { %vm665_vm9 = vmor %vm663_vm8, %vm664_vm7 }
 0x524   : > { %v659_v42 = vmul.f32 %v810_v40, %v658_v41 }
 0x526   : > { %v660_v43 = vmul.f32 0.5, %v659_v42 }
 0x528   : > { %v661_v44 = vsub.f32 1.5, %v660_v43 }
 0x52a   : > { %v662_v45 = vmul.f32 %v810_v40, %v661_v44 }
 0x52c   : > { %v666_v47 = vsel %vm665_vm9, %v810_v40, %v662_v45 }
 0x52d   : > { %v667_v49 = vmul.f32 %v666_v47, %v650_v35 }
 0x52f   : > { %v672_v50 = vmul.f32 %v789_v46, %v667_v49 }
 0x531   : > { %v677_v51 = vadd.f32 %v790_v48, %v672_v50 }
 0x533   : > { %678 = vst.msk [vmem:[%s287_s30] sm:$0xff] %vm293_vm0, %v677_v51 }
 0x534 PF: > { %s17_s24 = sadd.s32 1, %s817_s24  }
 0x535   : > { %p14_p4 = scmp.ge.s32.totalorder %s17_s24, 4  }
 0x537   :  { %16 = sbr.rel (!%p14_p4) target bundleno = 1 (0x1), region = 81 }

</bundles_post_ra>
